<compile_context>
chip_gen: v7x
topology: tpu7x:2x2x1
jax: 0.10.0
libtpu: 0.0.40
codegen_flags: <defaults>
</compile_context>

<pallas_src>
import functools

import jax
import jax.numpy as jnp
from jax import lax
from jax.experimental import pallas as pl
from jax.experimental.pallas import tpu as pltpu


def _round_up(x, m):
    return (x + m - 1) // m * m


def _tpu_config():
    """Generation-aware knobs: VMEM budget for the pipelined blocks, a safe
    vmem_limit cap, minimum grid steps (v7x: 2 TensorCores), and whether bf16
    inputs must be promoted to f32 (no bf16 VPU/EUP on v5e)."""
    kind = ""
    try:
        dev = jax.devices()[0]
        if dev.platform == "tpu":
            kind = dev.device_kind.lower()
    except Exception:
        pass
    if "v7" in kind:
        # 64 MiB physical VMEM, 2 TCs: smaller blocks, force >= 2 grid steps.
        return dict(budget_bytes=20 << 20, vmem_cap_bytes=48 << 20,
                    min_grid=2, force_f32=False)
    if "v6" in kind:
        return dict(budget_bytes=48 << 20, vmem_cap_bytes=100 << 20,
                    min_grid=1, force_f32=False)
    if "v5" in kind and ("lite" in kind or "v5e" in kind):
        # 16 MiB scoped default; modest budget + explicitly raised limit.
        return dict(budget_bytes=10 << 20, vmem_cap_bytes=64 << 20,
                    min_grid=1, force_f32=True)
    # Unknown generation (v4/v5p/interpret): conservative.
    return dict(budget_bytes=12 << 20, vmem_cap_bytes=64 << 20,
                min_grid=1, force_f32=True)


def _choose_block_b(B, S, NS, NI, in_itemsize, cd_itemsize, cfg):
    """Largest batch block whose *padded* VMEM footprint fits the budget.

    Returns (block_b, per_row_bytes, const_bytes) so the caller can recompute
    the real footprint if it overrides block_b.
    """
    L = S * NS
    L_pad = _round_up(L, 128)
    # Double-buffered pipelined HBM<->VMEM blocks (padded lane widths), per row.
    pipelined = 2 * (L_pad * in_itemsize             # slot in
                     + L_pad * in_itemsize           # out
                     + _round_up(NI, 128) * in_itemsize)  # intent in
    # In-kernel temporaries in the compute dtype (slot copy, isl_tiled, prod,
    # w_full, out value) -- single-buffered, generous estimate.
    temps = 5 * L_pad * cd_itemsize
    per_row = pipelined + temps
    # Small constant operands (tiled W^T / bias, seg, rep), double-buffered.
    const_bytes = 2 * cd_itemsize * (
        _round_up(NI, 8) * L_pad          # tiled W^T
        + 8 * L_pad                       # tiled bias
        + L * _round_up(S, 128)           # seg (L, S)  -- lane-padded
        + _round_up(S, 8) * L_pad)        # rep (S, L)
    budget = max(cfg["budget_bytes"] - const_bytes, per_row)
    tb = max(1, budget // per_row)
    # v7x: ensure at least cfg["min_grid"] grid steps so both TCs get programs.
    tb = min(tb, pl.cdiv(B, cfg["min_grid"]), B)
    if tb < B:
        # When splitting the batch axis, (8,128) tiling needs block_b % 8 == 0.
        tb8 = (tb // 8) * 8
        tb = tb8 if tb8 > 0 else (8 if B > 8 else B)
    return int(tb), int(per_row), int(const_bytes)


def _prob_aware_gate_kernel(intent_ref, wt_ref, bias_ref, seg_ref, rep_ref,
                            slot_ref, out_ref, *, compute_dtype):
    cdt = compute_dtype
    intent = intent_ref[...].astype(cdt)            # (TB, NI)
    slot = slot_ref[...].astype(cdt)                # (TB, L) lane-dense

    # nn.Linear fused with tile-over-S: wt_ref is W^T pre-tiled to (NI, L),
    # bias_ref pre-tiled to (1, L) f32 -> isl_tiled[b, s*NS+n] == isl[b, n].
    isl_tiled = (lax.dot_general(intent, wt_ref[...],
                                 dimension_numbers=(((1,), (0,)), ((), ())),
                                 preferred_element_type=jnp.float32)
                 + bias_ref[...]).astype(cdt)       # (TB, L)

    # bmm(slot, isl^T): lane-dense elementwise product + per-slot segment sum
    # via a tiny constant (L, S) 0/1 matmul with f32 accumulation on the MXU.
    prod = slot * isl_tiled                         # (TB, L)
    w = lax.dot_general(prod, seg_ref[...],
                        dimension_numbers=(((1,), (0,)), ((), ())),
                        preferred_element_type=jnp.float32)          # (TB, S)

    # F.normalize(p=2, dim=1) over the S axis; clamping the sum of squares at
    # eps^2 = 1e-24 matches clamp_min(norm, 1e-12).  EUP rsqrt, no divide.
    sumsq = jnp.sum(w * w, axis=-1, keepdims=True)                   # (TB, 1)
    w = w * lax.rsqrt(jnp.maximum(sumsq, 1e-24))

    # Broadcast the normalized weight back over the NS lanes of every slot with
    # the constant (S, L) repeat matrix (rep == seg.T): another tiny MXU pass.
    w_full = lax.dot_general(w.astype(cdt), rep_ref[...],
                             dimension_numbers=(((1,), (0,)), ((), ())),
                             preferred_element_type=jnp.float32).astype(cdt)

    out_ref[...] = (slot + w_full * isl_tiled).astype(out_ref.dtype)


def prob_aware_gate(intent_logits, slot_logits, lin_weight, lin_bias, *, block_b=None):
    """intent_logits: (B, NI); slot_logits: (B, S, NS);
    lin_weight: (NS, NI) (PyTorch nn.Linear layout); lin_bias: (NS,)."""
    B, NI = intent_logits.shape
    _, S, NS = slot_logits.shape
    L = S * NS

    cfg = _tpu_config()
    in_dtype = slot_logits.dtype
    if in_dtype == jnp.bfloat16 and not cfg["force_f32"]:
        compute_dtype = jnp.bfloat16          # bf16-native VPU/MXU on v6e/v7x
    else:
        compute_dtype = jnp.float32
    in_itemsize = jnp.dtype(in_dtype).itemsize
    cd_itemsize = jnp.dtype(compute_dtype).itemsize

    auto_block, per_row, const_bytes = _choose_block_b(
        B, S, NS, NI, in_itemsize, cd_itemsize, cfg)
    if block_b is None:
        block_b = auto_block
    block_b = max(1, min(int(block_b), B))
    if block_b < B and block_b % 8 != 0:
        block_b = (block_b // 8) * 8 or min(8, B)   # keep (8,128) tiling legal
    grid_b = pl.cdiv(B, block_b)

    # Lane-dense views / constants -- all built ONCE in the wrapper (outside the
    # grid loop), never re-materialized per grid step inside the kernel.
    slot2d = slot_logits.reshape(B, L)                                # free reshape
    wt_tiled = jnp.tile(lin_weight.T.astype(compute_dtype), (1, S))   # (NI, L)
    bias_tiled = jnp.tile(lin_bias.astype(jnp.float32), S).reshape(1, L)
    lane_slot = jnp.arange(L, dtype=jnp.int32) // NS
    seg = (lane_slot[:, None] ==
           jnp.arange(S, dtype=jnp.int32)[None, :]).astype(compute_dtype)  # (L, S)
    rep = seg.T                                                       # (S, L)

    # Pure HBM-streaming kernel: advertise the byte traffic, near-zero flops.
    cost = pl.CostEstimate(
        flops=int(B * (2 * NI * L + 4 * S * L + 5 * L)),
        transcendentals=int(B),
        bytes_accessed=int(2 * B * L * in_itemsize
                           + B * NI * jnp.dtype(intent_logits.dtype).itemsize
                           + (NI * L + L + 2 * S * L) * cd_itemsize),
    )

    needed_bytes = block_b * per_row + const_bytes
    vmem_limit = int(min(cfg["vmem_cap_bytes"],
                         max(needed_bytes + (8 << 20), 32 << 20)))

    kernel = functools.partial(_prob_aware_gate_kernel, compute_dtype=compute_dtype)
    out2d = pl.pallas_call(
        kernel,
        out_shape=jax.ShapeDtypeStruct((B, L), slot_logits.dtype),
        grid_spec=pltpu.PrefetchScalarGridSpec(
            num_scalar_prefetch=0,
            grid=(grid_b,),
            in_specs=[
                pl.BlockSpec((block_b, NI), lambda b: (b, 0)),    # intent rows
                pl.BlockSpec((NI, L), lambda b: (0, 0)),          # tiled W^T
                pl.BlockSpec((1, L), lambda b: (0, 0)),           # tiled bias (f32)
                pl.BlockSpec((L, S), lambda b: (0, 0)),           # segment-sum matrix
                pl.BlockSpec((S, L), lambda b: (0, 0)),           # repeat matrix
                pl.BlockSpec((block_b, L), lambda b: (b, 0)),     # lane-dense slot block
            ],
            out_specs=pl.BlockSpec((block_b, L), lambda b: (b, 0)),
        ),
        compiler_params=pltpu.CompilerParams(
            dimension_semantics=("parallel",),
            vmem_limit_bytes=vmem_limit,
        ),
        cost_estimate=cost,
    )(intent_logits, wt_tiled, bias_tiled, seg, rep, slot2d)
    return out2d.reshape(B, S, NS)


def prob_aware_gate_reference(intent_logits, slot_logits, lin_weight, lin_bias):
    isl = intent_logits @ lin_weight.T + lin_bias              # (B, NS)
    isl = isl[:, None, :]                                      # (B, 1, NS)
    w = jnp.sum(slot_logits * isl, axis=-1, keepdims=True)     # (B, S, 1) == bmm
    norm = jnp.sqrt(jnp.sum(w * w, axis=1, keepdims=True))     # F.normalize(dim=1)
    w = w / jnp.maximum(norm, 1e-12)
    return slot_logits + w * isl


if __name__ == "__main__":
    B, S = 2, 8            # batch, sequence length
    NUM_INTENT = 16
    NUM_SLOT = 32

    key = jax.random.PRNGKey(0)
    k1, k2, k3, k4 = jax.random.split(key, 4)

    intent_logits = jax.random.normal(k1, (B, NUM_INTENT), dtype=jnp.float32)
    slot_logits = jax.random.normal(k2, (B, S, NUM_SLOT), dtype=jnp.float32)
    # Deterministic "Linear(num_intent, num_slot)" parameters (PyTorch layout).
    lin_weight = 0.1 * jax.random.normal(k3, (NUM_SLOT, NUM_INTENT), dtype=jnp.float32)
    lin_bias = 0.1 * jax.random.normal(k4, (NUM_SLOT,), dtype=jnp.float32)

    out = prob_aware_gate(intent_logits, slot_logits, lin_weight, lin_bias)
    out = jax.block_until_ready(out)
    ref = prob_aware_gate_reference(intent_logits, slot_logits, lin_weight, lin_bias)
    assert out.shape == (B, S, NUM_SLOT)
    assert jnp.allclose(out, ref, atol=1e-5, rtol=1e-5), "mismatch (auto block)"

    # Exercise the multi-program batch-blocked path: 16 batches split into 2
    # blocks of 8 (the kind of split used on v7x so both TensorCores are fed).
    B2 = 16
    k5, k6 = jax.random.split(jax.random.PRNGKey(1), 2)
    intent2 = jax.random.normal(k5, (B2, NUM_INTENT), dtype=jnp.float32)
    slot2 = jax.random.normal(k6, (B2, S, NUM_SLOT), dtype=jnp.float32)
    out2 = prob_aware_gate(intent2, slot2, lin_weight, lin_bias, block_b=8)
    out2 = jax.block_until_ready(out2)
    ref2 = prob_aware_gate_reference(intent2, slot2, lin_weight, lin_bias)
    assert jnp.allclose(out2, ref2, atol=1e-5, rtol=1e-5), "mismatch (batch-blocked)"

    print("KERNEL_OK")
</pallas_src>

<mosaic_0001>
module attributes {stable_mosaic.version = 11 : i64} {
  func.func @_prob_aware_gate_kernel(%arg0: i32, %arg1: memref<2x16xf32, #tpu.memory_space<vmem>>, %arg2: memref<16x256xf32, #tpu.memory_space<vmem>>, %arg3: memref<1x256xf32, #tpu.memory_space<vmem>>, %arg4: memref<256x8xf32, #tpu.memory_space<vmem>>, %arg5: memref<8x256xf32, #tpu.memory_space<vmem>>, %arg6: memref<2x256xf32, #tpu.memory_space<vmem>>, %arg7: memref<2x256xf32, #tpu.memory_space<vmem>>) attributes {dimension_semantics = [#tpu.dimension_semantics<parallel>], iteration_bounds = array<i64: 1>, scalar_prefetch = 0 : i64, scratch_operands = 0 : i64, tpu.core_type = #tpu.core_type<tc>, window_params = [{transform_indices = @transform_0, window_bounds = array<i64: 2, 16>}, {pipeline_mode = #tpu.pipeline_mode<synchronous>, transform_indices = @transform_1, window_bounds = array<i64: 16, 256>}, {pipeline_mode = #tpu.pipeline_mode<synchronous>, transform_indices = @transform_2, window_bounds = array<i64: 1, 256>}, {pipeline_mode = #tpu.pipeline_mode<synchronous>, transform_indices = @transform_3, window_bounds = array<i64: 256, 8>}, {pipeline_mode = #tpu.pipeline_mode<synchronous>, transform_indices = @transform_4, window_bounds = array<i64: 8, 256>}, {transform_indices = @transform_5, window_bounds = array<i64: 2, 256>}, {transform_indices = @transform_6, window_bounds = array<i64: 2, 256>}]} {
    %c0 = arith.constant 0 : index
    %c0_0 = arith.constant 0 : index
    %0 = vector.load %arg1[%c0, %c0_0] : memref<2x16xf32, #tpu.memory_space<vmem>>, vector<2x16xf32>
    %c0_1 = arith.constant 0 : index
    %c0_2 = arith.constant 0 : index
    %1 = vector.load %arg6[%c0_1, %c0_2] : memref<2x256xf32, #tpu.memory_space<vmem>>, vector<2x256xf32>
    %c0_3 = arith.constant 0 : index
    %c0_4 = arith.constant 0 : index
    %2 = vector.load %arg2[%c0_3, %c0_4] : memref<16x256xf32, #tpu.memory_space<vmem>>, vector<16x256xf32>
    %cst = arith.constant dense<0.000000e+00> : vector<2x256xf32>
    %3 = tpu.matmul %0, %2, %cst {dimension_numbers = #tpu.dot_dimension_numbers<[1], [0], [0], [1], [0, 0, 1, 1], [], []>} : vector<2x16xf32>, vector<16x256xf32>, vector<2x256xf32> -> vector<2x256xf32>
    %c0_5 = arith.constant 0 : index
    %c0_6 = arith.constant 0 : index
    %4 = vector.load %arg3[%c0_5, %c0_6] : memref<1x256xf32, #tpu.memory_space<vmem>>, vector<1x256xf32>
    %5 = vector.broadcast %4 : vector<1x256xf32> to vector<2x256xf32>
    %6 = arith.addf %3, %5 : vector<2x256xf32>
    %7 = arith.mulf %1, %6 : vector<2x256xf32>
    %c0_7 = arith.constant 0 : index
    %c0_8 = arith.constant 0 : index
    %8 = vector.load %arg4[%c0_7, %c0_8] : memref<256x8xf32, #tpu.memory_space<vmem>>, vector<256x8xf32>
    %cst_9 = arith.constant dense<0.000000e+00> : vector<2x8xf32>
    %9 = tpu.matmul %7, %8, %cst_9 {dimension_numbers = #tpu.dot_dimension_numbers<[1], [0], [0], [1], [0, 0, 1, 1], [], []>} : vector<2x256xf32>, vector<256x8xf32>, vector<2x8xf32> -> vector<2x8xf32>
    %10 = arith.mulf %9, %9 : vector<2x8xf32>
    %cst_10 = arith.constant dense<0.000000e+00> : vector<2xf32>
    %11 = vector.multi_reduction <add>, %10, %cst_10 [1] : vector<2x8xf32> to vector<2xf32>
    %12 = vector.shape_cast %11 : vector<2xf32> to vector<2x1xf32>
    %cst_11 = arith.constant 1.000000e-24 : f32
    %13 = vector.broadcast %cst_11 : f32 to vector<2x1xf32>
    %14 = arith.maximumf %12, %13 : vector<2x1xf32>
    %15 = math.rsqrt %14 : vector<2x1xf32>
    %16 = vector.broadcast %15 : vector<2x1xf32> to vector<2x8xf32>
    %17 = arith.mulf %9, %16 : vector<2x8xf32>
    %c0_12 = arith.constant 0 : index
    %c0_13 = arith.constant 0 : index
    %18 = vector.load %arg5[%c0_12, %c0_13] : memref<8x256xf32, #tpu.memory_space<vmem>>, vector<8x256xf32>
    %cst_14 = arith.constant dense<0.000000e+00> : vector<2x256xf32>
    %19 = tpu.matmul %17, %18, %cst_14 {dimension_numbers = #tpu.dot_dimension_numbers<[1], [0], [0], [1], [0, 0, 1, 1], [], []>} : vector<2x8xf32>, vector<8x256xf32>, vector<2x256xf32> -> vector<2x256xf32>
    %20 = arith.mulf %19, %6 : vector<2x256xf32>
    %21 = arith.addf %1, %20 : vector<2x256xf32>
    %c0_15 = arith.constant 0 : index
    %c0_16 = arith.constant 0 : index
    %22 = vector.load %arg7[%c0_15, %c0_16] : memref<2x256xf32, #tpu.memory_space<vmem>>, vector<2x256xf32>
    tpu.vector_store %arg7[%c0_15, %c0_16], %21 {strides = array<i32>} : memref<2x256xf32, #tpu.memory_space<vmem>>, vector<2x256xf32>,
    return
  }
  func.func @transform_0(%arg0: i32) -> (i32, i32) {
    %c0_i32 = arith.constant 0 : i32
    %c0_i32_0 = arith.constant 0 : i32
    return %arg0, %c0_i32 : i32, i32
  }
  func.func @transform_1(%arg0: i32) -> (i32, i32) {
    %c0_i32 = arith.constant 0 : i32
    %c0_i32_0 = arith.constant 0 : i32
    %c0_i32_1 = arith.constant 0 : i32
    return %c0_i32, %c0_i32_0 : i32, i32
  }
  func.func @transform_2(%arg0: i32) -> (i32, i32) {
    %c0_i32 = arith.constant 0 : i32
    %c0_i32_0 = arith.constant 0 : i32
    %c0_i32_1 = arith.constant 0 : i32
    return %c0_i32, %c0_i32_0 : i32, i32
  }
  func.func @transform_3(%arg0: i32) -> (i32, i32) {
    %c0_i32 = arith.constant 0 : i32
    %c0_i32_0 = arith.constant 0 : i32
    %c0_i32_1 = arith.constant 0 : i32
    return %c0_i32, %c0_i32_0 : i32, i32
  }
  func.func @transform_4(%arg0: i32) -> (i32, i32) {
    %c0_i32 = arith.constant 0 : i32
    %c0_i32_0 = arith.constant 0 : i32
    %c0_i32_1 = arith.constant 0 : i32
    return %c0_i32, %c0_i32_0 : i32, i32
  }
  func.func @transform_5(%arg0: i32) -> (i32, i32) {
    %c0_i32 = arith.constant 0 : i32
    %c0_i32_0 = arith.constant 0 : i32
    return %arg0, %c0_i32 : i32, i32
  }
  func.func @transform_6(%arg0: i32) -> (i32, i32) {
    %c0_i32 = arith.constant 0 : i32
    %c0_i32_0 = arith.constant 0 : i32
    return %arg0, %c0_i32 : i32, i32
  }
}

</mosaic_0001>

<bundles_post_ra>
// kernel: tpu_custom_call.1
= control target key start
LH: loop header
LB: loop body
LE: loop exit
PB: predicated region body
PF: predicated region fallthrough
CT: control target
= control target key end

     0   :  { %v458_v5 = vmov 0.0   ;;  %vm42_vm0 = vcmask 130048   ;;  %s631_s0 = inlined_call_operand.vmem [shape: f32[2,16], index: 0, kind: input, shape index: {}]   ;;  %s632_s1 = inlined_call_operand.vmem [shape: f32[16,256], index: 1, kind: input, shape index: {}]   ;;  %s633_s2 = inlined_call_operand.vmem [shape: f32[1,256], index: 2, kind: input, shape index: {}]   ;;  %s634_s3 = inlined_call_operand.vmem [shape: f32[256,8], index: 3, kind: input, shape index: {}]   ;;  %s635_s4 = inlined_call_operand.vmem [shape: f32[8,256], index: 4, kind: input, shape index: {}]   ;;  %s636_s5 = inlined_call_operand.vmem [shape: f32[2,256], index: 5, kind: input, shape index: {}]   ;;  %s637_s6 = inlined_call_operand.hbm [shape: f32[2,256], index: 6, kind: output, shape index: {}]  }
   0x1   :  { %v27_v0 = vld [vmem:[%s632_s1 + $0x8] sm:$0xff]  ;;  %v29_v1 = vld [vmem:[%s632_s1 + $0x18] sm:$0xff]  ;;  %v26_v2 = vld [vmem:[%s632_s1] sm:$0xff]  ;;  %110 = vmatprep.mubr.f32.mxu0 %v458_v5 }
   0x2   :  { %v393_v3 = vpack.c.bf16 %v29_v1, %v27_v0  ;;  %v28_v4 = vld [vmem:[%s632_s1 + $0x10] sm:$0xff]  ;;  %v145_v6 = vld [vmem:[%s634_s3 + $0x80] sm:$0xff]  ;;  %v146_v9 = vld [vmem:[%s634_s3 + $0x88] sm:$0xff] }
   0x3   :  { %v395_v7 = vpack.c.bf16 %v28_v4, %v26_v2  ;;  %v24_v8 = vld [vmem:[%s631_s0] sm:$0x3]  ;;  %v130_v11 = vld [vmem:[%s634_s3 + $0x8] sm:$0xff]  ;;  %v397_v12 = vpack.c.bf16 %v146_v9, %v145_v6  ;;  %v147_v14 = vld [vmem:[%s634_s3 + $0x90] sm:$0xff] }
   0x4   :  { %v129_v10 = vld [vmem:[%s634_s3] sm:$0xff]  ;;  %394 = vmatprep.subr.bf16.mxu0 %v393_v3  ;;  %v148_v15 = vld [vmem:[%s634_s3 + $0x98] sm:$0xff]  ;;  %v131_v16 = vld [vmem:[%s634_s3 + $0x10] sm:$0xff] }
   0x5   :  { %v399_v13 = vpack.c.bf16 %v130_v11, %v129_v10  ;;  %396 = vmatpush1.bf16.msra.mxu0 %v395_v7  ;;  %v401_v17 = vpack.c.bf16 %v148_v15, %v147_v14  ;;  %v132_v18 = vld [vmem:[%s634_s3 + $0x18] sm:$0xff]  ;;  %v149_v19 = vld [vmem:[%s634_s3 + $0xa0] sm:$0xff]  ;;  %v150_v20 = vld [vmem:[%s634_s3 + $0xa8] sm:$0xff]  ;;  %398 = vmatprep.subr.bf16.mxu1 %v397_v12 }
   0x6   :  { %v403_v21 = vpack.c.bf16 %v132_v18, %v131_v16  ;;  %v405_v22 = vpack.c.bf16 %v150_v20, %v149_v19  ;;  %v133_v23 = vld [vmem:[%s634_s3 + $0x20] sm:$0xff]  ;;  %v134_v24 = vld [vmem:[%s634_s3 + $0x28] sm:$0xff]  ;;  %v151_v25 = vld [vmem:[%s634_s3 + $0xb0] sm:$0xff] }
   0x7   :  { %400 = vmatpush3.bf16.msra.mxu1 %v399_v13  ;;  %v152_v26 = vld [vmem:[%s634_s3 + $0xb8] sm:$0xff] }
   0x8   :  { %356 = vmatmul.mubr.msk.f32.vlgmr.msra.gmra.mrb[0].mxu0 %vm42_vm0, %v24_v8  ;;  %402 = vmatprep.subr.bf16.mxu1 %v401_v17 }
   0x9   :  { %320 = vmatprep.mubr.f32.mxu0 %v458_v5 }
   0xa   :  { %11 = vsyncpa [#allocation3], 0  ;;  %v407_v27 = vpack.c.bf16 %v134_v24, %v133_v23  ;;  %v409_v28 = vpack.c.bf16 %v152_v26, %v151_v25  ;;  %v135_v29 = vld [vmem:[%s634_s3 + $0x30] sm:$0xff]  ;;  %v136_v30 = vld [vmem:[%s634_s3 + $0x38] sm:$0xff]  ;;  %v32_v56 = vlaneseq  ;;  %v459_v61 = vmov 1983009808  }
   0xb   :  { %404 = vmatpush3.bf16.msra.mxu1 %v403_v21  ;;  %v153_v31 = vld [vmem:[%s634_s3 + $0xc0] sm:$0xff]  ;;  %v154_v32 = vld [vmem:[%s634_s3 + $0xc8] sm:$0xff]  ;;  %v411_v33 = vpack.c.bf16 %v136_v30, %v135_v29  ;;  %v155_v38 = vld [vmem:[%s634_s3 + $0xd0] sm:$0xff]  ;;  %v121_v62 = vunpack.c.l.s4 %v459_v61  ;;  %vm243_vm1 = vcmask 58368   ;;  %vm252_vm2 = vcmask 64512   ;;  %s460_s22 = smov [#allocation2]  }
   0xc   :  { %406 = vmatprep.subr.bf16.mxu1 %v405_v22  ;;  %v413_v34 = vpack.c.bf16 %v154_v32, %v153_v31  ;;  %v137_v35 = vld [vmem:[%s634_s3 + $0x40] sm:$0xff]  ;;  %v138_v36 = vld [vmem:[%s634_s3 + $0x48] sm:$0xff]  ;;  %v156_v39 = vld [vmem:[%s634_s3 + $0xd8] sm:$0xff]  ;;  %v33_v57 = vshrl.u32 %v32_v56, 7  ;;  %s348_s23 = sshll.u32 %s460_s22, 4  ;;  %s349_s23 = int_to_ptr.vmem [resolvable:$true] %s348_s23 }
   0xd   :  { %v415_v37 = vpack.c.bf16 %v138_v36, %v137_v35  ;;  %v417_v40 = vpack.c.bf16 %v156_v39, %v155_v38  ;;  %v139_v41 = vld [vmem:[%s634_s3 + $0x50] sm:$0xff]  ;;  %v140_v42 = vld [vmem:[%s634_s3 + $0x58] sm:$0xff]  ;;  %v157_v44 = vld [vmem:[%s634_s3 + $0xe0] sm:$0xff]  ;;  %v122_v1 = vunpack.c.0.s8 %v121_v62  ;;  %p439_p1 = scmp.lt.s32.totalorder %s349_s23, %s349_s23 }
   0xe   :  { %v419_v43 = vpack.c.bf16 %v140_v42, %v139_v41  ;;  %v158_v45 = vld [vmem:[%s634_s3 + $0xe8] sm:$0xff]  ;;  %v141_v47 = vld [vmem:[%s634_s3 + $0x60] sm:$0xff]  ;;  %v159_v50 = vld [vmem:[%s634_s3 + $0xf0] sm:$0xff]  ;;  %v34_v58 = vsub.s32 0, %v33_v57  ;;  %v38_v60 = vsub.s32 1, %v33_v57 }
   0xf   :  { %408 = vmatpush3.bf16.msra.mxu1 %v407_v27  ;;  %v421_v46 = vpack.c.bf16 %v158_v45, %v157_v44  ;;  %v142_v48 = vld [vmem:[%s634_s3 + $0x68] sm:$0xff]  ;;  %v160_v51 = vld [vmem:[%s634_s3 + $0xf8] sm:$0xff]  ;;  %v143_v52 = vld [vmem:[%s634_s3 + $0x70] sm:$0xff]  ;;  %v125_v6 = vsub.s32 %v122_v1, %v33_v57 }
  0x10   :  { %410 = vmatprep.subr.bf16.mxu1 %v409_v28  ;;  %v423_v49 = vpack.c.bf16 %v142_v48, %v141_v47  ;;  %v425_v53 = vpack.c.bf16 %v160_v51, %v159_v50  ;;  %v144_v54 = vld [vmem:[%s634_s3 + $0x78] sm:$0xff]  ;;  %v30_v59 = vld [vmem:[%s633_s2] sm:$0x3]  ;;  %v251_v18 = vld [vmem:[%s635_s4 + $0x8] sm:$0xff] }
  0x11   :  { %v427_v55 = vpack.c.bf16 %v144_v54, %v143_v52  ;;  %v35_v63 = vrot.slane %v30_v59, %v34_v58  ;;  %v39_v0 = vrot.slane %v30_v59, %v38_v60  ;;  %v25_v8 = vld [vmem:[%s636_s5] sm:$0xf]  ;;  %256 = vmatprep.subr.mxu0 %v251_v18 }
  0x12   :  { %v250_v19 = vld [vmem:[%s635_s4] sm:$0xff]  ;;  %s434_s4 = scalar_lea.vmem %s349_s23, 64 }
  0x13   :  { %412 = vmatpush3.bf16.msra.mxu1 %v411_v33  ;;  %257 = vmatpush1.msra.mxu0 %v250_v19  ;;  %p435_p0 = scmp.ne.s32.totalorder %s349_s23, %s434_s4  ;;  %p440_p2 = scmp.lt.s32.totalorder %s434_s4, %s434_s4 }
  0x14   :  { %414 = vmatprep.subr.bf16.mxu1 %v413_v34 }
  0x15   :  { %p441_p3 = por %p440_p2, %p439_p1 }
  0x17   :  { %416 = vmatpush3.bf16.msra.mxu1 %v415_v37  ;;  %p442_p4 = pnand %p441_p3, %p435_p0 }
  0x18   :  { %418 = vmatprep.subr.bf16.mxu1 %v417_v40 }
  0x1b   :  { %420 = vmatpush3.bf16.msra.mxu1 %v419_v43 }
  0x1c   :  { %422 = vmatprep.subr.bf16.mxu1 %v421_v46 }
  0x1f   :  { %424 = vmatpush3.bf16.msra.mxu1 %v423_v49 }
  0x20   :  { %426 = vmatprep.subr.bf16.mxu1 %v425_v53 }
  0x23   :  { %428 = vmatpush3.bf16.msra.mxu1 %v427_v55 }
  0xdb   :  { %v112_v2 = vpop.f32.mrb[0].mxu0 }
  0xdc   :  { %v113_v3 = vadd.f32 %v112_v2, %v35_v63  ;;  %v114_v4 = vpop.f32.mrb[1].mxu0 }
  0xdd   :  { %v115_v5 = vadd.f32 %v114_v4, %v39_v0 }
  0xdf   :  { %v119_v7 = vcombine.low %v113_v3, %v115_v5 }
  0xe1   :  { %v126_v9 = vrot.slane %v119_v7, %v125_v6 }
  0xe3   :  { %v128_v10 = vmul.f32 %v126_v9, %v25_v8 }
  0xe5   :  { %v168_v11 = vrot.slane %v128_v10, %v125_v6 }
  0xe7   :  { %v169_v12 = vcombine.high %v168_v11, %v168_v11 }
  0xe9   :  { %236 = vmatprep.mubr.f32.mxu1 %v169_v12 }
  0xea   :  { %237 = vmatmul.mubr.f32.vlgmr.msra.gmra.mrb[0].mxu1 %v168_v11 }
 0x1bd   :  { %v390_v13 = vpop.f32.mrb[0].mxu1 }
 0x1be   :  { %v391_v14 = vpop.f32.mrb[1].mxu1 }
 0x1bf   :  { %v392_v15 = vadd.f32 %v391_v14, %v390_v13 }
 0x1c1   :  { %v242_v16 = vmul.f32 %v392_v15, %v392_v15 }
 0x1c3   :  { %v244_v17 = vsel %vm243_vm1, %v242_v16, 0.0 }
 0x1c4   :  { %245 = vadd.xlane.f32.xlu0 %v244_v17 }
 0x251   :  { %v246_v20 = vpop.xlane.xlu0 %245 }
 0x252   :  { %v247_v21 = vmax.f32 %v246_v20, 1e-24 }
 0x254   :  { %432 = vrsqrt.f32 %v247_v21 }
 0x25e   :  { %v433_v22 = vpop.eup %432 }
 0x25f   :  { %v249_v23 = vmul.f32 %v433_v22, %v392_v15 }
 0x261   :  { %357 = vmatmul.mubr.msk.f32.vlgmr.msra.gmra.mrb[2].mxu0 %vm252_vm2, %v249_v23 }
 0x334   :  { %v322_v24 = vpop.f32.mrb[2].mxu0 }
 0x335   :  { %v327_v25 = vmul.f32 %v322_v24, %v113_v3  ;;  %v324_v26 = vpop.f32.mrb[3].mxu0 }
 0x336   :  { %v328_v27 = vmul.f32 %v324_v26, %v115_v5 }
 0x338   :  { %v331_v28 = vcombine.low %v327_v25, %v328_v27 }
 0x33a   :  { %v338_v29 = vrot.slane %v331_v28, %v125_v6 }
 0x33c   :  { %v340_v30 = vadd.f32 %v338_v29, %v25_v8 }
 0x33e   :  { %341 = vst [vmem:[#allocation2] sm:$0xf] %v340_v30 }
 0x33f   :  { %445 = shalt.err (!%p442_p4)
}
 0x340   :  { %s446_s26 = scalar_lea.hbm %s637_s6, 64 }
 0x341   :  { %p447_p5 = scmp.ne.s32.totalorder %s637_s6, %s446_s26  ;;  %p450_p6 = scmp.lt.u32.totalorder %s446_s26, %s637_s6 }
 0x343   :  { %p452_p7 = pnand %p450_p6, %p447_p5 }
 0x345   :  { %455 = shalt.err (!%p452_p7)
}
 0x346   :  { %351 = dma.vmem_to_hbm [thread:$0]  %s349_s23, 64, %s637_s6, [#allocation3]  }
 0x347   :  { %456 = dma.done.wait [#allocation3], 64  }
 0x348   :  { %457 = vsyncadd [#allocation3], 4294967232 }
 0x349   :  { %355 = vsyncpa [#allocation3], 1 }

</bundles_post_ra>
